<compile_context>
chip_gen: v7x
topology: tpu7x:2x2x1
jax: 0.10.0
libtpu: 0.0.40
codegen_flags: <defaults>
</compile_context>

<pallas_src>
import functools

import jax
import jax.numpy as jnp
from jax.experimental import pallas as pl
from jax.experimental.pallas import tpu as pltpu

IN_FEATURES = 32
HIDDEN1 = 512
HIDDEN2 = 128
NUM_CLASSES = 10

LANE = 128          # TPU lane width
ROW_PACK = 16       # bf16 sublane packing: 16 rows per vreg
MAX_TM = 1024       # batch-tile row cap (VMEM is not the constraint here)
XLA_FALLBACK_BATCH = 64


def _round_up(n, m):
    return (n + m - 1) // m * m


def _cdiv(a, b):
    return -(-a // b)


# ----------------------------------------------------------------------------
# Kernel
# ----------------------------------------------------------------------------
def classifier_kernel(x_ref, w1_ref, b1_ref, w2_ref, b2_ref, w3_ref, b3_ref,
                      out_ref, feat_ref):
    # fc1: bf16 operands on the MXU, f32 accumulation; bias+ReLU in f32
    h1 = jnp.dot(x_ref[...], w1_ref[...], preferred_element_type=jnp.float32)
    h1 = jnp.maximum(h1 + b1_ref[...], 0.0)
    # TODO(synk): dropout is identity in eval mode; training-mode dropout would
    # use pltpu.prng_seed + pltpu.stateful_bernoulli here and after fc2.

    # fc2 + bias + ReLU -> feat
    feat = jnp.dot(h1.astype(w2_ref.dtype), w2_ref[...],
                   preferred_element_type=jnp.float32)
    feat = jnp.maximum(feat + b2_ref[...], 0.0)

    # fc3 on feat; N is pre-padded to 128 lanes so this store is lane-dense.
    logits = jnp.dot(feat.astype(w3_ref.dtype), w3_ref[...],
                     preferred_element_type=jnp.float32)
    logits = logits + b3_ref[...]

    # bf16 outputs: halves the writeback bytes that dominate large batches.
    feat_ref[...] = feat.astype(feat_ref.dtype)
    out_ref[...] = logits.astype(out_ref.dtype)


# ----------------------------------------------------------------------------
# BlockSpec helpers
# ----------------------------------------------------------------------------
def _resident_spec(shape):
    """Constant-index block (weights/biases): fetched once, stays in VMEM.

    Request single-buffering when the installed Pallas supports pipeline_mode;
    the second buffer is pure VMEM waste for a block that never changes.
    """
    index_map = lambda i: (0, 0)
    try:
        return pl.BlockSpec(shape, index_map, pipeline_mode=pl.Buffered(1))
    except (AttributeError, TypeError):
        return pl.BlockSpec(shape, index_map)


def _choose_tm(batch):
    """Batch-tile rows: multiple of 16 (bf16 packing), <= 1024, padding waste
    bounded (<= 15 rows + rounding), and >= 2 grid steps once the batch is big
    enough so v7x megacore can shard the parallel axis."""
    b16 = _round_up(batch, ROW_PACK)
    if b16 <= 256:
        return b16                              # single step, minimal padding
    steps = max(2, _cdiv(b16, MAX_TM))          # >= 2 steps for megacore
    return min(MAX_TM, _round_up(_cdiv(b16, steps), ROW_PACK))


# ----------------------------------------------------------------------------
# Forward
# ----------------------------------------------------------------------------
@functools.partial(jax.jit, static_argnames=("num_classes", "use_pallas"))
def _forward(x, w1, b1, w2, b2, w3p, b3p, *, num_classes, use_pallas):
    batch, in_features = x.shape
    h1_dim = w1.shape[1]
    h2_dim = w2.shape[1]
    n_pad = w3p.shape[1]

    xb = x.astype(jnp.bfloat16)

    if not use_pallas:
        # Tiny-batch latency path: one fused XLA region beats the fixed
        # pallas_call + grid-step overhead for ~1 MFLOP of work.
        a1 = jnp.maximum(
            jnp.dot(xb, w1, preferred_element_type=jnp.float32) + b1, 0.0)
        feat = jnp.maximum(
            jnp.dot(a1.astype(jnp.bfloat16), w2,
                    preferred_element_type=jnp.float32) + b2, 0.0)
        logits = jnp.dot(feat.astype(jnp.bfloat16), w3p,
                         preferred_element_type=jnp.float32) + b3p
        return (logits[:, :num_classes].astype(jnp.bfloat16),
                feat.astype(jnp.bfloat16))

    tm = _choose_tm(batch)
    b_pad = _round_up(batch, tm)
    if b_pad != batch:
        xb = jnp.pad(xb, ((0, b_pad - batch), (0, 0)))
    grid = (b_pad // tm,)

    flops = 2 * b_pad * (in_features * h1_dim + h1_dim * h2_dim + h2_dim * n_pad)
    bytes_accessed = (
        xb.size * 2                                   # bf16 activations in
        + (w1.size + w2.size + w3p.size) * 2          # bf16 weights (resident)
        + (b1.size + b2.size + b3p.size) * 4          # f32 biases
        + b_pad * (n_pad + h2_dim) * 2)               # bf16 outputs

    logits_p, feat_p = pl.pallas_call(
        classifier_kernel,
        out_shape=(
            jax.ShapeDtypeStruct((b_pad, n_pad), jnp.bfloat16),
            jax.ShapeDtypeStruct((b_pad, h2_dim), jnp.bfloat16),
        ),
        grid_spec=pltpu.PrefetchScalarGridSpec(
            num_scalar_prefetch=0,
            grid=grid,
            in_specs=[
                pl.BlockSpec((tm, in_features), lambda i: (i, 0)),  # x tile
                _resident_spec((in_features, h1_dim)),              # w1
                _resident_spec((1, h1_dim)),                        # b1
                _resident_spec((h1_dim, h2_dim)),                   # w2
                _resident_spec((1, h2_dim)),                        # b2
                _resident_spec((h2_dim, n_pad)),                    # w3 (padded)
                _resident_spec((1, n_pad)),                         # b3 (padded)
            ],
            out_specs=(
                pl.BlockSpec((tm, n_pad), lambda i: (i, 0)),
                pl.BlockSpec((tm, h2_dim), lambda i: (i, 0)),
            ),
        ),
        compiler_params=pltpu.CompilerParams(
            dimension_semantics=("parallel",)),
        cost_estimate=pl.CostEstimate(
            flops=flops, transcendentals=0, bytes_accessed=bytes_accessed),
    )(xb, w1, b1, w2, b2, w3p, b3p)

    return logits_p[:batch, :num_classes], feat_p[:batch, :]


def prepare_params(w1, b1, w2, b2, w3, b3):
    """One-time parameter prep: bf16 weight casts + fc3 lane-padding hoisted out
    of the per-call path (weights stored pre-transposed as [in, out])."""
    num_classes = w3.shape[1]
    n_pad = _round_up(num_classes, LANE)
    w3p = jnp.pad(w3, ((0, 0), (0, n_pad - num_classes)))
    b3p = jnp.pad(b3.reshape(1, -1), ((0, 0), (0, n_pad - num_classes)))
    params = dict(
        w1=w1.astype(jnp.bfloat16),
        b1=b1.reshape(1, -1).astype(jnp.float32),
        w2=w2.astype(jnp.bfloat16),
        b2=b2.reshape(1, -1).astype(jnp.float32),
        w3p=w3p.astype(jnp.bfloat16),
        b3p=b3p.astype(jnp.float32),
    )
    return params, num_classes


def custom_classifier_forward(x, params, num_classes, *, use_pallas=None):
    """x: [B, in_features] f32. Returns (logits [B, num_classes], feat [B, 128])
    in bfloat16 (cast outside if strict f32 outputs are needed)."""
    if use_pallas is None:
        use_pallas = x.shape[0] >= XLA_FALLBACK_BATCH
    return _forward(x, params["w1"], params["b1"], params["w2"], params["b2"],
                    params["w3p"], params["b3p"],
                    num_classes=num_classes, use_pallas=bool(use_pallas))


def init_linear(key, in_dim, out_dim):
    """Deterministic Kaiming-uniform-style init matching nn.Linear ranges."""
    kw, kb = jax.random.split(key)
    bound = 1.0 / jnp.sqrt(in_dim)
    w = jax.random.uniform(kw, (in_dim, out_dim), jnp.float32, -bound, bound)
    b = jax.random.uniform(kb, (out_dim,), jnp.float32, -bound, bound)
    return w, b


if __name__ == "__main__":
    key = jax.random.PRNGKey(0)
    kx_small, kx_big, k1, k2, k3 = jax.random.split(key, 5)

    w1, b1 = init_linear(k1, IN_FEATURES, HIDDEN1)
    w2, b2 = init_linear(k2, HIDDEN1, HIDDEN2)
    w3, b3 = init_linear(k3, HIDDEN2, NUM_CLASSES)
    params, num_classes = prepare_params(w1, b1, w2, b2, w3, b3)

    def reference(x):
        # Mimics the kernel's bf16-operand / f32-accumulate math in plain JAX.
        bf = lambda a: a.astype(jnp.bfloat16).astype(jnp.float32)
        h1 = jnp.maximum(bf(x) @ bf(w1) + b1.reshape(1, -1), 0.0)
        feat = jnp.maximum(bf(h1) @ bf(w2) + b2.reshape(1, -1), 0.0)
        logits = bf(feat) @ bf(w3) + b3.reshape(1, -1)
        return logits, feat

    # --- small batch (grid=(1,)): force the Pallas path so the kernel runs ---
    x_small = jax.random.normal(kx_small, (8, IN_FEATURES), jnp.float32)
    logits, feat = custom_classifier_forward(x_small, params, num_classes,
                                             use_pallas=True)
    jax.block_until_ready((logits, feat))
    logits_ref, feat_ref = reference(x_small)
    assert logits.shape == (8, NUM_CLASSES)
    assert feat.shape == (8, HIDDEN2)
    assert jnp.allclose(logits.astype(jnp.float32), logits_ref,
                        atol=5e-2, rtol=5e-2)
    assert jnp.allclose(feat.astype(jnp.float32), feat_ref,
                        atol=5e-2, rtol=5e-2)

    # --- larger ragged batch: exercises padding + >= 2 grid steps ------------
    x_big = jax.random.normal(kx_big, (260, IN_FEATURES), jnp.float32)
    logits_b, feat_b = custom_classifier_forward(x_big, params, num_classes)
    jax.block_until_ready((logits_b, feat_b))
    logits_bref, feat_bref = reference(x_big)
    assert logits_b.shape == (260, NUM_CLASSES)
    assert feat_b.shape == (260, HIDDEN2)
    assert jnp.allclose(logits_b.astype(jnp.float32), logits_bref,
                        atol=5e-2, rtol=5e-2)
    assert jnp.allclose(feat_b.astype(jnp.float32), feat_bref,
                        atol=5e-2, rtol=5e-2)

    print("KERNEL_OK")
</pallas_src>

<mosaic_0001>
module attributes {stable_mosaic.version = 11 : i64} {
  func.func @classifier_kernel(%arg0: i32, %arg1: memref<16x32xbf16, #tpu.memory_space<vmem>>, %arg2: memref<32x512xbf16, #tpu.memory_space<vmem>>, %arg3: memref<1x512xf32, #tpu.memory_space<vmem>>, %arg4: memref<512x128xbf16, #tpu.memory_space<vmem>>, %arg5: memref<1x128xf32, #tpu.memory_space<vmem>>, %arg6: memref<128x128xbf16, #tpu.memory_space<vmem>>, %arg7: memref<1x128xf32, #tpu.memory_space<vmem>>, %arg8: memref<16x128xbf16, #tpu.memory_space<vmem>>, %arg9: memref<16x128xbf16, #tpu.memory_space<vmem>>) attributes {dimension_semantics = [#tpu.dimension_semantics<parallel>], iteration_bounds = array<i64: 1>, scalar_prefetch = 0 : i64, scratch_operands = 0 : i64, tpu.core_type = #tpu.core_type<tc>, window_params = [{transform_indices = @transform_0, window_bounds = array<i64: 16, 32>}, {pipeline_mode = #tpu.pipeline_mode<synchronous>, transform_indices = @transform_1, window_bounds = array<i64: 32, 512>}, {pipeline_mode = #tpu.pipeline_mode<synchronous>, transform_indices = @transform_2, window_bounds = array<i64: 1, 512>}, {pipeline_mode = #tpu.pipeline_mode<synchronous>, transform_indices = @transform_3, window_bounds = array<i64: 512, 128>}, {pipeline_mode = #tpu.pipeline_mode<synchronous>, transform_indices = @transform_4, window_bounds = array<i64: 1, 128>}, {pipeline_mode = #tpu.pipeline_mode<synchronous>, transform_indices = @transform_5, window_bounds = array<i64: 128, 128>}, {pipeline_mode = #tpu.pipeline_mode<synchronous>, transform_indices = @transform_6, window_bounds = array<i64: 1, 128>}, {transform_indices = @transform_7, window_bounds = array<i64: 16, 128>}, {transform_indices = @transform_8, window_bounds = array<i64: 16, 128>}]} {
    %c0 = arith.constant 0 : index
    %c0_0 = arith.constant 0 : index
    %0 = vector.load %arg1[%c0, %c0_0] : memref<16x32xbf16, #tpu.memory_space<vmem>>, vector<16x32xbf16>
    %c0_1 = arith.constant 0 : index
    %c0_2 = arith.constant 0 : index
    %1 = vector.load %arg2[%c0_1, %c0_2] : memref<32x512xbf16, #tpu.memory_space<vmem>>, vector<32x512xbf16>
    %cst = arith.constant dense<0.000000e+00> : vector<16x512xf32>
    %2 = tpu.matmul %0, %1, %cst {dimension_numbers = #tpu.dot_dimension_numbers<[1], [0], [0], [1], [0, 0, 1, 1], [], []>} : vector<16x32xbf16>, vector<32x512xbf16>, vector<16x512xf32> -> vector<16x512xf32>
    %c0_3 = arith.constant 0 : index
    %c0_4 = arith.constant 0 : index
    %3 = vector.load %arg3[%c0_3, %c0_4] : memref<1x512xf32, #tpu.memory_space<vmem>>, vector<1x512xf32>
    %4 = vector.broadcast %3 : vector<1x512xf32> to vector<16x512xf32>
    %5 = arith.addf %2, %4 : vector<16x512xf32>
    %cst_5 = arith.constant 0.000000e+00 : f32
    %6 = vector.broadcast %cst_5 : f32 to vector<16x512xf32>
    %7 = arith.maximumf %5, %6 : vector<16x512xf32>
    %8 = arith.truncf %7 : vector<16x512xf32> to vector<16x512xbf16>
    %c0_6 = arith.constant 0 : index
    %c0_7 = arith.constant 0 : index
    %9 = vector.load %arg4[%c0_6, %c0_7] : memref<512x128xbf16, #tpu.memory_space<vmem>>, vector<512x128xbf16>
    %cst_8 = arith.constant dense<0.000000e+00> : vector<16x128xf32>
    %10 = tpu.matmul %8, %9, %cst_8 {dimension_numbers = #tpu.dot_dimension_numbers<[1], [0], [0], [1], [0, 0, 1, 1], [], []>} : vector<16x512xbf16>, vector<512x128xbf16>, vector<16x128xf32> -> vector<16x128xf32>
    %c0_9 = arith.constant 0 : index
    %c0_10 = arith.constant 0 : index
    %11 = vector.load %arg5[%c0_9, %c0_10] : memref<1x128xf32, #tpu.memory_space<vmem>>, vector<1x128xf32>
    %12 = vector.broadcast %11 : vector<1x128xf32> to vector<16x128xf32>
    %13 = arith.addf %10, %12 : vector<16x128xf32>
    %cst_11 = arith.constant 0.000000e+00 : f32
    %14 = vector.broadcast %cst_11 : f32 to vector<16x128xf32>
    %15 = arith.maximumf %13, %14 : vector<16x128xf32>
    %16 = arith.truncf %15 : vector<16x128xf32> to vector<16x128xbf16>
    %c0_12 = arith.constant 0 : index
    %c0_13 = arith.constant 0 : index
    %17 = vector.load %arg6[%c0_12, %c0_13] : memref<128x128xbf16, #tpu.memory_space<vmem>>, vector<128x128xbf16>
    %cst_14 = arith.constant dense<0.000000e+00> : vector<16x128xf32>
    %18 = tpu.matmul %16, %17, %cst_14 {dimension_numbers = #tpu.dot_dimension_numbers<[1], [0], [0], [1], [0, 0, 1, 1], [], []>} : vector<16x128xbf16>, vector<128x128xbf16>, vector<16x128xf32> -> vector<16x128xf32>
    %c0_15 = arith.constant 0 : index
    %c0_16 = arith.constant 0 : index
    %19 = vector.load %arg7[%c0_15, %c0_16] : memref<1x128xf32, #tpu.memory_space<vmem>>, vector<1x128xf32>
    %20 = vector.broadcast %19 : vector<1x128xf32> to vector<16x128xf32>
    %21 = arith.addf %18, %20 : vector<16x128xf32>
    %22 = arith.truncf %15 : vector<16x128xf32> to vector<16x128xbf16>
    %c0_17 = arith.constant 0 : index
    %c0_18 = arith.constant 0 : index
    %23 = vector.load %arg9[%c0_17, %c0_18] : memref<16x128xbf16, #tpu.memory_space<vmem>>, vector<16x128xbf16>
    tpu.vector_store %arg9[%c0_17, %c0_18], %22 {strides = array<i32>} : memref<16x128xbf16, #tpu.memory_space<vmem>>, vector<16x128xbf16>,
    %24 = arith.truncf %21 : vector<16x128xf32> to vector<16x128xbf16>
    %c0_19 = arith.constant 0 : index
    %c0_20 = arith.constant 0 : index
    %25 = vector.load %arg8[%c0_19, %c0_20] : memref<16x128xbf16, #tpu.memory_space<vmem>>, vector<16x128xbf16>
    tpu.vector_store %arg8[%c0_19, %c0_20], %24 {strides = array<i32>} : memref<16x128xbf16, #tpu.memory_space<vmem>>, vector<16x128xbf16>,
    return
  }
  func.func @transform_0(%arg0: i32) -> (i32, i32) {
    %c0_i32 = arith.constant 0 : i32
    %c0_i32_0 = arith.constant 0 : i32
    return %arg0, %c0_i32 : i32, i32
  }
  func.func @transform_1(%arg0: i32) -> (i32, i32) {
    %c0_i32 = arith.constant 0 : i32
    %c0_i32_0 = arith.constant 0 : i32
    %c0_i32_1 = arith.constant 0 : i32
    return %c0_i32, %c0_i32_0 : i32, i32
  }
  func.func @transform_2(%arg0: i32) -> (i32, i32) {
    %c0_i32 = arith.constant 0 : i32
    %c0_i32_0 = arith.constant 0 : i32
    %c0_i32_1 = arith.constant 0 : i32
    return %c0_i32, %c0_i32_0 : i32, i32
  }
  func.func @transform_3(%arg0: i32) -> (i32, i32) {
    %c0_i32 = arith.constant 0 : i32
    %c0_i32_0 = arith.constant 0 : i32
    %c0_i32_1 = arith.constant 0 : i32
    return %c0_i32, %c0_i32_0 : i32, i32
  }
  func.func @transform_4(%arg0: i32) -> (i32, i32) {
    %c0_i32 = arith.constant 0 : i32
    %c0_i32_0 = arith.constant 0 : i32
    %c0_i32_1 = arith.constant 0 : i32
    return %c0_i32, %c0_i32_0 : i32, i32
  }
  func.func @transform_5(%arg0: i32) -> (i32, i32) {
    %c0_i32 = arith.constant 0 : i32
    %c0_i32_0 = arith.constant 0 : i32
    %c0_i32_1 = arith.constant 0 : i32
    return %c0_i32, %c0_i32_0 : i32, i32
  }
  func.func @transform_6(%arg0: i32) -> (i32, i32) {
    %c0_i32 = arith.constant 0 : i32
    %c0_i32_0 = arith.constant 0 : i32
    %c0_i32_1 = arith.constant 0 : i32
    return %c0_i32, %c0_i32_0 : i32, i32
  }
  func.func @transform_7(%arg0: i32) -> (i32, i32) {
    %c0_i32 = arith.constant 0 : i32
    %c0_i32_0 = arith.constant 0 : i32
    return %arg0, %c0_i32 : i32, i32
  }
  func.func @transform_8(%arg0: i32) -> (i32, i32) {
    %c0_i32 = arith.constant 0 : i32
    %c0_i32_0 = arith.constant 0 : i32
    return %arg0, %c0_i32 : i32, i32
  }
}

</mosaic_0001>

<bundles_post_ra>
// kernel: _forward.1
= control target key start
LH: loop header
LB: loop body
LE: loop exit
PB: predicated region body
PF: predicated region fallthrough
CT: control target
= control target key end

     0   :  { %14 = vsyncpa [#allocation3], 0  ;;  %s1141_s0 = inlined_call_operand.vmem [shape: bf16[16,32], index: 0, kind: input, shape index: {}]   ;;  %s1142_s1 = inlined_call_operand.hbm [shape: bf16[32,512], index: 1, kind: input, shape index: {}]   ;;  %s1143_s2 = inlined_call_operand.vmem [shape: f32[1,512], index: 2, kind: input, shape index: {}]   ;;  %s1144_s3 = inlined_call_operand.hbm [shape: bf16[512,128], index: 3, kind: input, shape index: {}]   ;;  %s1145_s4 = inlined_call_operand.vmem [shape: f32[1,128], index: 4, kind: input, shape index: {}]   ;;  %s1146_s5 = inlined_call_operand.hbm [shape: bf16[128,128], index: 5, kind: input, shape index: {}]   ;;  %s1147_s6 = inlined_call_operand.vmem [shape: f32[1,128], index: 6, kind: input, shape index: {}]   ;;  %s1148_s7 = inlined_call_operand.vmem [shape: bf16[16,128], index: 7, kind: output, shape index: {0}]   ;;  %s1149_s8 = inlined_call_operand.vmem [shape: bf16[16,128], index: 8, kind: output, shape index: {1}]  }
   0x1   :  { %15 = vsyncpa [#allocation5], 0  ;;  %s1015_s27 = smov [#allocation4]   ;;  %s945_s9 = scalar_lea.hbm %s1144_s3, 4096 }
   0x2   :  { %s37_s28 = sshll.u32 %s1015_s27, 4  ;;  %p946_p0 = scmp.ne.s32.totalorder %s1144_s3, %s945_s9  ;;  %s38_s28 = int_to_ptr.vmem [resolvable:$true] %s37_s28 }
   0x3   :  { %p949_p1 = scmp.lt.u32.totalorder %s945_s9, %s1144_s3 }
   0x5   :  { %p951_p2 = pnand %p949_p1, %p946_p0 }
   0x7   :  { %954 = shalt.err (!%p951_p2)
}
   0x8   :  { %s955_s14 = scalar_lea.vmem %s38_s28, 4096  ;;  %p960_p4 = scmp.lt.s32.totalorder %s38_s28, %s38_s28 }
   0x9   :  { %p956_p3 = scmp.ne.s32.totalorder %s38_s28, %s955_s14  ;;  %p961_p5 = scmp.lt.s32.totalorder %s955_s14, %s955_s14 }
   0xb   :  { %p962_p6 = por %p961_p5, %p960_p4 }
   0xd   :  { %p963_p7 = pnand %p962_p6, %p956_p3 }
   0xf   :  { %966 = shalt.err (!%p963_p7)
}
  0x10   :  { %s1016_s15 = smov 64   ;;  %s1017_s16 = smov 4  }
  0x11   :  { %43 = dma.hbm_to_vmem [thread:$0]  %s1144_s3, 4096, %s38_s28, [#allocation5], %s1016_s15, %s1016_s15, %s1017_s16  }
  0x12   :  { %s1018_s19 = smov [#allocation2]   ;;  %s967_s23 = scalar_lea.hbm %s1142_s1, 1024 }
  0x13   :  { %s23_s20 = sshll.u32 %s1018_s19, 4  ;;  %p968_p8 = scmp.ne.s32.totalorder %s1142_s1, %s967_s23  ;;  %s24_s20 = int_to_ptr.vmem [resolvable:$true] %s23_s20 }
  0x14   :  { %p971_p9 = scmp.lt.u32.totalorder %s967_s23, %s1142_s1 }
  0x16   :  { %p973_p10 = pnand %p971_p9, %p968_p8 }
  0x18   :  { %976 = shalt.err (!%p973_p10)
}
  0x19   :  { %s977_s29 = scalar_lea.vmem %s24_s20, 1024  ;;  %p982_p12 = scmp.lt.s32.totalorder %s24_s20, %s24_s20 }
  0x1a   :  { %p978_p11 = scmp.ne.s32.totalorder %s24_s20, %s977_s29  ;;  %p983_p13 = scmp.lt.s32.totalorder %s977_s29, %s977_s29 }
  0x1c   :  { %p984_p0 = por %p983_p13, %p982_p12 }
  0x1e   :  { %p985_p1 = pnand %p984_p0, %p978_p11 }
  0x20   :  { %988 = shalt.err (!%p985_p1)
}
  0x21   :  { %s1019_s3 = smov 256   ;;  %s1020_s28 = smov 16  }
  0x22   :  { %29 = dma.hbm_to_vmem [thread:$0]  %s1142_s1, 1024, %s24_s20, [#allocation3], %s1019_s3, %s1019_s3, %s1020_s28  }
  0x23   :  { %s1021_s10 = smov [#allocation6]   ;;  %s989_s14 = scalar_lea.hbm %s1146_s5, 1024 }
  0x24   :  { %s51_s11 = sshll.u32 %s1021_s10, 4  ;;  %p990_p2 = scmp.ne.s32.totalorder %s1146_s5, %s989_s14  ;;  %s52_s11 = int_to_ptr.vmem [resolvable:$true] %s51_s11 }
  0x25   :  { %p993_p3 = scmp.lt.u32.totalorder %s989_s14, %s1146_s5 }
  0x27   :  { %p995_p4 = pnand %p993_p3, %p990_p2 }
  0x29   :  { %998 = shalt.err (!%p995_p4)
}
  0x2a   :  { %s999_s22 = scalar_lea.vmem %s52_s11, 1024  ;;  %p1004_p6 = scmp.lt.s32.totalorder %s52_s11, %s52_s11 }
  0x2b   :  { %p1000_p5 = scmp.ne.s32.totalorder %s52_s11, %s999_s22  ;;  %p1005_p7 = scmp.lt.s32.totalorder %s999_s22, %s999_s22 }
  0x2d   :  { %p1006_p8 = por %p1005_p7, %p1004_p6 }
  0x2f   :  { %p1007_p9 = pnand %p1006_p8, %p1000_p5 }
  0x31   :  { %1010 = shalt.err (!%p1007_p9)
}
  0x32   :  { %57 = dma.hbm_to_vmem [thread:$0]  %s1146_s5, 1024, %s52_s11, [#allocation5], %s1016_s15, %s1016_s15, %s1017_s16  }
  0x33   :  { %1011 = dma.done.wait [#allocation3], 1024  }
  0x34   :  { %1012 = vsyncadd [#allocation3], 4294966272 }
  0x35   :  { %1013 = dma.done.wait [#allocation5], 5120  }
  0x36   :  { %1014 = vsyncadd [#allocation5], 4294962176  ;;  %v1022_v0 = vmov 0   ;;  %v892_v1 = vld [vmem:[#allocation2 + $0x4] ss:$16 sps:$4 sm:$0xff]   ;;  %vm147_vm0 = vcmask 261120   ;;  %v82_v43 = vlaneseq }
  0x37   :  { %183 = vmatprep.mubr.bf16.mxu1 %v1022_v0  ;;  %v894_v2 = vld [vmem:[#allocation2] ss:$16 sps:$4 sm:$0xff]   ;;  %151 = vmatprep.subr.bf16.mxu1 %v892_v1  ;;  %v895_v3 = vld [vmem:[#allocation2 + $0x24] ss:$16 sps:$4 sm:$0xff]   ;;  %v901_v6 = vld [vmem:[#allocation2 + $0xc] ss:$16 sps:$4 sm:$0xff]  }
  0x38   :  { %152 = vmatpush1.bf16.msra.mxu1 %v894_v2  ;;  %v897_v4 = vld [vmem:[#allocation2 + $0x20] ss:$16 sps:$4 sm:$0xff]   ;;  %v899_v7 = vld [vmem:[#allocation2 + $0x8] ss:$16 sps:$4 sm:$0xff]   ;;  %v904_v8 = vld [vmem:[#allocation2 + $0x2c] ss:$16 sps:$4 sm:$0xff]  }
  0x39   :  { %153 = vmatprep.subr.bf16.mxu1 %v895_v3  ;;  %v898_v5 = vld [vmem:[%s1141_s0] sm:$0xff]   ;;  %v902_v11 = vld [vmem:[#allocation2 + $0x28] ss:$16 sps:$4 sm:$0xff]   ;;  %v909_v14 = vld [vmem:[#allocation4 + $0x50] sm:$0xff]   ;;  %v1023_v42 = vmov 0.0   ;;  %v83_v44 = vshrl.u32 %v82_v43, 7 }
  0x3a   :  { %v905_v9 = vld [vmem:[#allocation4 + $0x40] sm:$0xff]   ;;  %v907_v12 = vld [vmem:[#allocation4 + $0x48] sm:$0xff]   ;;  %v911_v16 = vld [vmem:[#allocation4 + $0x10] sm:$0xff]   ;;  %vm1024_vm1 = vmmov 0  }
  0x3b   :  { %v906_v10 = vld [vmem:[#allocation4] sm:$0xff]   ;;  %809 = vmatprep.subr.bf16.mxu0 %v905_v9  ;;  %v908_v13 = vld [vmem:[#allocation4 + $0x8] sm:$0xff]   ;;  %v913_v18 = vld [vmem:[#allocation4 + $0x58] sm:$0xff]   ;;  %v84_v45 = vsub.s32 0, %v83_v44  ;;  %v88_v47 = vsub.s32 1, %v83_v44  ;;  %v92_v53 = vsub.s32 2, %v83_v44 }
  0x3c   :  { %154 = vmatpush1.bf16.msra.mxu1 %v897_v4  ;;  %810 = vmatpush3.bf16.msra.mxu0 %v906_v10  ;;  %v910_v15 = vld [vmem:[#allocation4 + $0xc0] sm:$0xff]   ;;  %v914_v19 = vld [vmem:[#allocation4 + $0xc8] sm:$0xff]   ;;  %v915_v20 = vld [vmem:[#allocation4 + $0x18] sm:$0xff]   ;;  %v96_v56 = vsub.s32 3, %v83_v44 }
  0x3d   :  { %194 = vmatprep.subr.bf16.mxu1 %v901_v6  ;;  %811 = vmatprep.subr.bf16.mxu0 %v907_v12  ;;  %v912_v17 = vld [vmem:[#allocation4 + $0x80] sm:$0xff]   ;;  %v916_v21 = vld [vmem:[#allocation4 + $0x88] sm:$0xff]   ;;  %v918_v23 = vld [vmem:[#allocation4 + $0xd0] sm:$0xff]  }
  0x3e   :  { %v917_v22 = vld [vmem:[#allocation4 + $0x60] sm:$0xff]   ;;  %v920_v25 = vld [vmem:[#allocation4 + $0x90] sm:$0xff]   ;;  %v921_v26 = vld [vmem:[#allocation4 + $0x68] sm:$0xff]  }
  0x3f   :  { %747 = vmatmul.mubr.msk.bf16.vlgmr.msra.gmra.mrb[0].mxu1 %vm147_vm0, %v898_v5  ;;  %v919_v24 = vld [vmem:[#allocation4 + $0x20] sm:$0xff]   ;;  %v922_v27 = vld [vmem:[#allocation4 + $0xd8] sm:$0xff]   ;;  %v923_v28 = vld [vmem:[#allocation4 + $0x28] sm:$0xff]  }
  0x40   :  { %195 = vmatpush1.bf16.msra.mxu1 %v899_v7  ;;  %226 = vmatprep.mubr.bf16.mxu1 %v1022_v0  ;;  %v924_v29 = vld [vmem:[#allocation4 + $0x98] sm:$0xff]   ;;  %v925_v30 = vld [vmem:[#allocation4 + $0x70] sm:$0xff]   ;;  %v926_v31 = vld [vmem:[#allocation4 + $0xe0] sm:$0xff]  }
  0x41   :  { %196 = vmatprep.subr.bf16.mxu1 %v904_v8  ;;  %812 = vmatpush3.bf16.msra.mxu0 %v908_v13  ;;  %v927_v32 = vld [vmem:[#allocation4 + $0x30] sm:$0xff]   ;;  %v928_v33 = vld [vmem:[#allocation4 + $0xa0] sm:$0xff]   ;;  %v929_v34 = vld [vmem:[#allocation4 + $0x78] sm:$0xff]  }
  0x42   :  { %813 = vmatprep.subr.bf16.mxu0 %v909_v14  ;;  %v930_v35 = vld [vmem:[#allocation4 + $0xe8] sm:$0xff]   ;;  %v931_v36 = vld [vmem:[#allocation4 + $0x38] sm:$0xff]   ;;  %v933_v38 = vld [vmem:[#allocation4 + $0xf0] sm:$0xff]  }
  0x43   :  { %v932_v37 = vld [vmem:[#allocation4 + $0xa8] sm:$0xff]   ;;  %v934_v39 = vld [vmem:[#allocation4 + $0xb0] sm:$0xff]   ;;  %v935_v40 = vld [vmem:[#allocation4 + $0xf8] sm:$0xff]  }
  0x44   :  { %197 = vmatpush1.bf16.msra.mxu1 %v902_v11  ;;  %v936_v41 = vld [vmem:[#allocation4 + $0xb8] sm:$0xff]   ;;  %v80_v46 = vld [vmem:[%s1143_s2] sm:$0xf]  ;;  %v938_v13 = vld [vmem:[#allocation6 + $0x8] sm:$0xff]  }
  0x45   :  { %831 = vmatprep.subr.bf16.mxu1 %v910_v15  ;;  %814 = vmatpush3.bf16.msra.mxu0 %v911_v16  ;;  %v85_v48 = vrot.slane %v80_v46, %v84_v45  ;;  %v89_v49 = vrot.slane %v80_v46, %v88_v47  ;;  %v93_v62 = vrot.slane %v80_v46, %v92_v53 }
  0x46   :  { %815 = vmatprep.subr.bf16.mxu0 %v913_v18  ;;  %v97_v1 = vrot.slane %v80_v46, %v96_v56  ;;  %v782_v46 = vld [vmem:[%s1147_s6] ss:$0 sm:$0xff] }
  0x47   :  { %748 = vmatmul.mubr.msk.bf16.vlgmr.msra.gmra.mrb[4].mxu1 %vm147_vm0, %v898_v5  ;;  %v937_v5 = vld [vmem:[#allocation6] sm:$0xff]  }
  0x48   :  { %832 = vmatpush3.bf16.msra.mxu1 %v912_v17 }
  0x49   :  { %833 = vmatprep.subr.bf16.mxu1 %v914_v19  ;;  %816 = vmatpush3.bf16.msra.mxu0 %v915_v20  ;;  %v939_v20 = vld [vmem:[#allocation6 + $0x10] sm:$0xff]  }
  0x4a   :  { %817 = vmatprep.subr.bf16.mxu0 %v917_v22  ;;  %v941_v22 = vld [vmem:[#allocation6 + $0x20] sm:$0xff]  }
  0x4c   :  { %834 = vmatpush3.bf16.msra.mxu1 %v916_v21  ;;  %v940_v21 = vld [vmem:[#allocation6 + $0x18] sm:$0xff]  }
  0x4d   :  { %835 = vmatprep.subr.bf16.mxu1 %v918_v23  ;;  %818 = vmatpush3.bf16.msra.mxu0 %v919_v24  ;;  %v942_v23 = vld [vmem:[#allocation6 + $0x28] sm:$0xff]   ;;  %v943_v24 = vld [vmem:[#allocation6 + $0x30] sm:$0xff]  }
  0x4e   :  { %819 = vmatprep.subr.bf16.mxu0 %v921_v26 }
  0x50   :  { %836 = vmatpush3.bf16.msra.mxu1 %v920_v25  ;;  %v944_v25 = vld [vmem:[#allocation6 + $0x38] sm:$0xff]  }
  0x51   :  { %837 = vmatprep.subr.bf16.mxu1 %v922_v27  ;;  %820 = vmatpush3.bf16.msra.mxu0 %v923_v28 }
  0x52   :  { %821 = vmatprep.subr.bf16.mxu0 %v925_v30 }
  0x54   :  { %838 = vmatpush3.bf16.msra.mxu1 %v924_v29 }
  0x55   :  { %839 = vmatprep.subr.bf16.mxu1 %v926_v31  ;;  %822 = vmatpush3.bf16.msra.mxu0 %v927_v32  ;;  %v749_v32 = vld [vmem:[%s1145_s4] ss:$0 sm:$0xff] }
  0x56   :  { %823 = vmatprep.subr.bf16.mxu0 %v929_v34 }
  0x58   :  { %840 = vmatpush3.bf16.msra.mxu1 %v928_v33 }
  0x59   :  { %841 = vmatprep.subr.bf16.mxu1 %v930_v35  ;;  %824 = vmatpush3.bf16.msra.mxu0 %v931_v36 }
  0x5a   :  { %862 = vmatprep.subr.bf16.mxu0 %v1023_v42 }
  0x5c   :  { %842 = vmatpush3.bf16.msra.mxu1 %v932_v37 }
  0x5d   :  { %843 = vmatprep.subr.bf16.mxu1 %v933_v38 }
  0x60   :  { %844 = vmatpush3.bf16.msra.mxu1 %v934_v39 }
  0x61   :  { %845 = vmatprep.subr.bf16.mxu1 %v935_v40 }
  0x64   :  { %846 = vmatpush3.bf16.msra.mxu1 %v936_v41 }
 0x112   :  { %v185_v50 = vpop.f32.mrb[0].mxu1 }
 0x113   :  { %v186_v51 = vadd.f32 %v185_v50, %v85_v48  ;;  %v187_v52 = vpop.f32.mrb[1].mxu1 }
 0x114   :  { %v188_v54 = vadd.f32 %v187_v52, %v89_v49  ;;  %v189_v55 = vpop.f32.mrb[2].mxu1 }
 0x115   :  { %v190_v57 = vadd.f32 %v189_v55, %v85_v48  ;;  %v191_v58 = vpop.f32.mrb[3].mxu1  ;;  %v237_v60 = vmax.f32 %v186_v51, 0.0 }
 0x116   :  { %v192_v59 = vadd.f32 %v191_v58, %v89_v49  ;;  %v238_v63 = vmax.f32 %v188_v54, 0.0 }
 0x117   :  { %v241_v61 = vmax.f32 %v190_v57, 0.0 }
 0x118   :  { %v242_v0 = vmax.f32 %v192_v59, 0.0 }
 0x119   :  { %v245_v2 = vpack.c.bf16 %v241_v61, %v237_v60 }
 0x11a   :  { %v228_v3 = vpop.f32.mrb[4].mxu1  ;;  %v246_v4 = vpack.c.bf16 %v242_v0, %v238_v63 }
 0x11b   :  { %v229_v6 = vadd.f32 %v228_v3, %v93_v62  ;;  %v230_v7 = vpop.f32.mrb[5].mxu1 }
 0x11c   :  { %v231_v8 = vadd.f32 %v230_v7, %v97_v1  ;;  %v232_v9 = vpop.f32.mrb[6].mxu1  ;;  %544 = vmatprep.mubr.bf16.mxu0 %v246_v4 }
 0x11d   :  { %v233_v10 = vadd.f32 %v232_v9, %v93_v62  ;;  %v234_v11 = vpop.f32.mrb[7].mxu1  ;;  %545 = vmatmul.mubr.bf16.vlgmr.msra.gmra.mrb[0].mxu0 %v245_v2  ;;  %v239_v14 = vmax.f32 %v229_v6, 0.0 }
 0x11e   :  { %v235_v12 = vadd.f32 %v234_v11, %v97_v1  ;;  %863 = vmatpush3.bf16.msra.mxu0 %v937_v5  ;;  %v240_v16 = vmax.f32 %v231_v8, 0.0  ;;  %878 = vmatprep.mubr.msk.bf16.mxu0 %vm1024_vm1, %v1023_v42 }
 0x11f   :  { %v243_v15 = vmax.f32 %v233_v10, 0.0  ;;  %864 = vmatprep.subr.bf16.mxu0 %v1023_v42 }
 0x120   :  { %v244_v17 = vmax.f32 %v235_v12, 0.0 }
 0x121   :  { %v247_v18 = vpack.c.bf16 %v243_v15, %v239_v14 }
 0x122   :  { %v248_v19 = vpack.c.bf16 %v244_v17, %v240_v16  ;;  %865 = vmatpush3.bf16.msra.mxu0 %v938_v13 }
 0x123   :  { %866 = vmatprep.subr.bf16.mxu0 %v1023_v42 }
 0x124   :  { %585 = vmatprep.mubr.bf16.mxu1 %v248_v19 }
 0x125   :  { %586 = vmatmul.mubr.bf16.vlgmr.msra.gmra.mrb[8].mxu1 %v247_v18 }
 0x126   :  { %867 = vmatpush3.bf16.msra.mxu0 %v939_v20 }
 0x127   :  { %868 = vmatprep.subr.bf16.mxu0 %v1023_v42 }
 0x12a   :  { %869 = vmatpush3.bf16.msra.mxu0 %v940_v21 }
 0x12b   :  { %870 = vmatprep.subr.bf16.mxu0 %v1023_v42 }
 0x12e   :  { %871 = vmatpush3.bf16.msra.mxu0 %v941_v22 }
 0x12f   :  { %872 = vmatprep.subr.bf16.mxu0 %v1023_v42 }
 0x132   :  { %873 = vmatpush3.bf16.msra.mxu0 %v942_v23 }
 0x133   :  { %874 = vmatprep.subr.bf16.mxu0 %v1023_v42 }
 0x136   :  { %875 = vmatpush3.bf16.msra.mxu0 %v943_v24 }
 0x137   :  { %876 = vmatprep.subr.bf16.mxu0 %v1023_v42 }
 0x13a   :  { %877 = vmatpush3.bf16.msra.mxu0 %v944_v25 }
 0x1f0   :  { %v825_v26 = vpop.f32.mrb[0].mxu0 }
 0x1f1   :  { %v826_v27 = vpop.f32.mrb[1].mxu0 }
 0x1f2   :  { %v827_v28 = vadd.f32 %v826_v27, %v825_v26  ;;  %v828_v29 = vpop.f32.mrb[2].mxu0 }
 0x1f3   :  { %v829_v30 = vpop.f32.mrb[3].mxu0 }
 0x1f4   :  { %v830_v31 = vadd.f32 %v829_v30, %v828_v29  ;;  %v547_v35 = vadd.f32 %v827_v28, %v749_v32 }
 0x1f6   :  { %v550_v39 = vadd.f32 %v830_v31, %v749_v32 }
 0x1f8   :  { %v847_v33 = vpop.f32.mrb[8].mxu1 }
 0x1f9   :  { %v848_v34 = vpop.f32.mrb[9].mxu1 }
 0x1fa   :  { %v849_v36 = vadd.f32 %v848_v34, %v847_v33  ;;  %v850_v37 = vpop.f32.mrb[10].mxu1 }
 0x1fb   :  { %v851_v38 = vpop.f32.mrb[11].mxu1 }
 0x1fc   :  { %v588_v40 = vadd.f32 %v849_v36, %v547_v35  ;;  %v852_v41 = vadd.f32 %v851_v38, %v850_v37 }
 0x1fe   :  { %v591_v42 = vadd.f32 %v852_v41, %v550_v39  ;;  %v594_v43 = vmax.f32 %v588_v40, 0.0 }
 0x200   :  { %v595_v44 = vmax.f32 %v591_v42, 0.0 }
 0x202   :  { %v596_v45 = vpack.c.bf16 %v595_v44, %v594_v43 }
 0x204   :  { %803 = vst [vmem:[%s1149_s8] sm:$0xff] %v596_v45   ;;  %879 = vmatmul.mubr.bf16.vlgmr.msra.gmra.mrb[4].mxu0 %v596_v45 }
 0x2d7   :  { %v702_v47 = vpop.f32.mrb[4].mxu0 }
 0x2d8   :  { %v880_v48 = vpop.f32.mrb[5].mxu0  ;;  %v703_v50 = vadd.f32 %v782_v46, %v702_v47 }
 0x2d9   :  { %v705_v49 = vpop.f32.mrb[6].mxu0 }
 0x2da   :  { %v706_v51 = vadd.f32 %v782_v46, %v705_v49  ;;  %v881_v52 = vpop.f32.mrb[7].mxu0 }
 0x2dc   :  { %v807_v53 = vpack.c.bf16 %v706_v51, %v703_v50 }
 0x2de   :  { %808 = vst [vmem:[%s1148_s7] sm:$0xff] %v807_v53  }
 0x2df   :  { %736 = vsyncpa [#allocation3], 1 }
 0x2e0   :  { %737 = vsyncpa [#allocation5], 1 }

</bundles_post_ra>
